<compile_context>
chip_gen: v5e
topology: v5e:2x2
jax: 0.10.0
libtpu: 0.0.40
codegen_flags: <defaults>
</compile_context>

<pallas_src>
import math
import functools

import jax
import jax.numpy as jnp
from jax.experimental import pallas as pl
from jax.experimental.pallas import tpu as pltpu


def _mha_kernel(xq_ref, xk_ref, xv_ref, bias_ref,
                wqkv_ref, bqkv_ref, wo_ref, bo_ref, o_ref, *, n_heads):
    """One batch element: full MHA forward, heads handled as a batch dim."""
    T, Dp = xq_ref.shape
    cdt = wqkv_ref.dtype                      # MXU compute dtype (f32 or bf16)

    # Head-broadcast, stacked inputs: (3*n_heads, T, Dp). Tiny VMEM cost; keeps
    # every downstream op head-batched with zero relayouts.
    xq = jnp.broadcast_to(xq_ref[...][None], (n_heads, T, Dp))
    xk = jnp.broadcast_to(xk_ref[...][None], (n_heads, T, Dp))
    xv = jnp.broadcast_to(xv_ref[...][None], (n_heads, T, Dp))
    x = jnp.concatenate([xq, xk, xv], axis=0)

    # Fused Q/K/V projection: one batched MXU op + one bias add.
    # The 1/sqrt(d_k) scale is already folded into the Q slice of wqkv/bqkv.
    qkv = jnp.einsum("htd,hkd->htk", x, wqkv_ref[...],
                     preferred_element_type=jnp.float32) + bqkv_ref[...]

    q = qkv[0 * n_heads:1 * n_heads].astype(cdt)     # (n_heads, T, d_k)
    k = qkv[1 * n_heads:2 * n_heads].astype(cdt)
    v = qkv[2 * n_heads:3 * n_heads].astype(cdt)

    # Scores for all heads at once; contract d_k in natural layout (no .T).
    s = jnp.einsum("hqd,hkd->hqk", q, k,
                   preferred_element_type=jnp.float32)        # (n_heads, T, T)
    s = s + bias_ref[...]                                     # additive mask bias

    # Softmax over keys, in f32; reciprocal goes to the (otherwise idle) EUP.
    m = jnp.max(s, axis=-1, keepdims=True)
    p = jnp.exp(s - m)
    denom = jnp.sum(p, axis=-1, keepdims=True)
    attn = p * pl.reciprocal(denom, approx=True)

    # Weighted values and output projection, both head-batched; the head
    # reduction is a cheap leading-dim sum (no lane concatenate).
    a = jnp.einsum("hqk,hkd->hqd", attn.astype(cdt), v,
                   preferred_element_type=jnp.float32)        # (n_heads, T, d_k)
    out_h = jnp.einsum("htk,hkd->htd", a.astype(cdt), wo_ref[...],
                       preferred_element_type=jnp.float32)    # (n_heads, T, Dp)
    out = jnp.sum(out_h, axis=0) + bo_ref[...]                # (T, Dp) lane-dense
    o_ref[...] = out.astype(o_ref.dtype)


def _prep_params(params, *, n_heads, d_k, d_model, d_pad, compute_dtype):
    """Repack nn.Linear-style params into head-major, lane-dense kernel layout."""
    scale = 1.0 / math.sqrt(d_k)

    def split_heads(w, b, s):
        # w: (d_model, H), b: (1, H); kernel computes x @ w + b per head.
        wh = (w * s).reshape(d_model, n_heads, d_k).transpose(1, 2, 0)   # (h,d_k,D)
        wh = jnp.pad(wh, ((0, 0), (0, 0), (0, d_pad - d_model)))
        bh = (b * s).reshape(1, n_heads, d_k).transpose(1, 0, 2)         # (h,1,d_k)
        return wh, bh

    wq, bq = split_heads(params["wq"], params["bq"], scale)   # scale folded into Q
    wk, bk = split_heads(params["wk"], params["bk"], 1.0)
    wv, bv = split_heads(params["wv"], params["bv"], 1.0)
    w_qkv = jnp.concatenate([wq, wk, wv], axis=0).astype(compute_dtype)  # (3h,d_k,Dp)
    b_qkv = jnp.concatenate([bq, bk, bv], axis=0).astype(jnp.float32)    # (3h,1,d_k)

    wo = params["wo"].reshape(n_heads, d_k, d_model)                     # (h,d_k,D)
    wo = jnp.pad(wo, ((0, 0), (0, 0), (0, d_pad - d_model))).astype(compute_dtype)
    bo = jnp.pad(params["bo"], ((0, 0), (0, d_pad - d_model))).astype(jnp.float32)
    return w_qkv, b_qkv, wo, bo


def multi_head_attention(q, k, v, mask, params, *, n_heads, d_k,
                         compute_dtype=jnp.float32):
    N, T, D = q.shape
    Dp = ((D + 127) // 128) * 128        # lane-dense feature dim (multiple of 128)

    def pad_feat(x):
        return jnp.pad(x, ((0, 0), (0, 0), (0, Dp - D))).astype(compute_dtype)

    qp, kp, vp = pad_feat(q), pad_feat(k), pad_feat(v)

    # Additive mask bias computed once on the host: 0 = keep, -1e30 = masked
    # (matches torch's masked_fill(mask == 0, -inf) without the inf-inf hazard).
    if mask is None:
        bias = jnp.zeros((N, 1, T), jnp.float32)
    else:
        bias = jnp.where(mask == 0, jnp.float32(-1e30),
                         jnp.float32(0.0)).reshape(N, 1, T)

    w_qkv, b_qkv, wo, bo = _prep_params(
        params, n_heads=n_heads, d_k=d_k, d_model=D, d_pad=Dp,
        compute_dtype=compute_dtype)

    kern = functools.partial(_mha_kernel, n_heads=n_heads)

    seq_spec = pl.BlockSpec((None, T, Dp), lambda b: (b, 0, 0))

    def resident(shape):
        # Constant index map -> block never changes across the grid, so the
        # weights stay resident in VMEM (no per-batch re-streaming).
        return pl.BlockSpec(shape, lambda b, _z=(0,) * len(shape): _z)

    out = pl.pallas_call(
        kern,
        out_shape=jax.ShapeDtypeStruct((N, T, Dp), jnp.float32),
        grid=(N,),
        in_specs=[
            seq_spec, seq_spec, seq_spec,
            pl.BlockSpec((None, 1, T), lambda b: (b, 0, 0)),
            resident(w_qkv.shape),
            resident(b_qkv.shape),
            resident(wo.shape),
            resident(bo.shape),
        ],
        out_specs=pl.BlockSpec((None, T, Dp), lambda b: (b, 0, 0)),
        compiler_params=pltpu.CompilerParams(
            dimension_semantics=("parallel",),
            vmem_limit_bytes=32 * 1024 * 1024),   # generous headroom, valid on v5e/v6e/v7x
    )(qp, kp, vp, bias, w_qkv, b_qkv, wo, bo)

    return out[:, :, :D]


def _init_linear(key, in_f, out_f):
    """Deterministic nn.Linear-style init; weight returned as (in, out)."""
    kw, kb = jax.random.split(key)
    bound = 1.0 / math.sqrt(in_f)
    w = jax.random.uniform(kw, (in_f, out_f), jnp.float32, -bound, bound)
    b = jax.random.uniform(kb, (1, out_f), jnp.float32, -bound, bound)
    return w, b


def _reference(q, k, v, mask, params, *, n_heads, d_k):
    """Plain-JAX reference matching the PyTorch forward."""
    N, T, D = q.shape
    qp = q @ params["wq"] + params["bq"]
    kp = k @ params["wk"] + params["bk"]
    vp = v @ params["wv"] + params["bv"]
    qp = qp.reshape(N, T, n_heads, d_k).transpose(0, 2, 1, 3)
    kp = kp.reshape(N, T, n_heads, d_k).transpose(0, 2, 1, 3)
    vp = vp.reshape(N, T, n_heads, d_k).transpose(0, 2, 1, 3)
    scores = jnp.einsum("nhtd,nhsd->nhts", qp, kp) / math.sqrt(d_k)
    scores = jnp.where(mask[:, None, None, :] == 0, -jnp.inf, scores)
    w = jax.nn.softmax(scores, axis=-1)
    A = jnp.einsum("nhts,nhsd->nhtd", w, vp)
    A = A.transpose(0, 2, 1, 3).reshape(N, T, n_heads * d_k)
    return A @ params["wo"] + params["bo"]


if __name__ == "__main__":
    # Small shapes consistent with the module: batch=2, seq=8, d_model=32, heads=4, d_k=8.
    N, T, d_model, n_heads, d_k = 2, 8, 32, 4, 8
    H = n_heads * d_k

    root = jax.random.PRNGKey(0)
    kq, kk, kv, ko, kx1, kx2, kx3 = jax.random.split(root, 7)

    wq, bq = _init_linear(kq, d_model, H)
    wk, bk = _init_linear(kk, d_model, H)
    wv, bv = _init_linear(kv, d_model, H)
    wo, bo = _init_linear(ko, H, d_model)
    params = dict(wq=wq, bq=bq, wk=wk, bk=bk, wv=wv, bv=bv, wo=wo, bo=bo)

    q = jax.random.normal(kx1, (N, T, d_model), jnp.float32)
    k = jax.random.normal(kx2, (N, T, d_model), jnp.float32)
    v = jax.random.normal(kx3, (N, T, d_model), jnp.float32)
    # mask: keep everything in batch 0; mask out last two key positions in batch 1.
    mask = jnp.ones((N, T), jnp.float32).at[1, -2:].set(0.0)

    ref = _reference(q, k, v, mask, params, n_heads=n_heads, d_k=d_k)

    # f32 compute path (v5e-friendly; softmax is f32 everywhere).
    out_f32 = multi_head_attention(q, k, v, mask, params, n_heads=n_heads,
                                   d_k=d_k, compute_dtype=jnp.float32)
    out_f32 = jax.block_until_ready(out_f32)
    assert out_f32.shape == (N, T, d_model)
    # Tolerance loosened slightly vs exact math because of the approximate
    # EUP reciprocal in the softmax.
    assert jnp.allclose(out_f32, ref, atol=1e-2, rtol=1e-2), "f32 mismatch vs reference"

    # bf16 MXU path (v6e/v7x): bf16 matmul inputs, f32 accumulation + softmax.
    out_bf16 = multi_head_attention(q, k, v, mask, params, n_heads=n_heads,
                                    d_k=d_k, compute_dtype=jnp.bfloat16)
    out_bf16 = jax.block_until_ready(out_bf16)
    assert out_bf16.shape == (N, T, d_model)
    assert jnp.allclose(out_bf16, ref, atol=5e-2, rtol=5e-2), "bf16 mismatch vs reference"

    print("KERNEL_OK")
</pallas_src>

<mosaic_0001>
module attributes {stable_mosaic.version = 11 : i64} {
  func.func @_mha_kernel(%arg0: i32, %arg1: memref<1x8x128xf32, #tpu.memory_space<vmem>>, %arg2: memref<1x8x128xf32, #tpu.memory_space<vmem>>, %arg3: memref<1x8x128xf32, #tpu.memory_space<vmem>>, %arg4: memref<1x1x8xf32, #tpu.memory_space<vmem>>, %arg5: memref<12x8x128xf32, #tpu.memory_space<vmem>>, %arg6: memref<12x1x8xf32, #tpu.memory_space<vmem>>, %arg7: memref<4x8x128xf32, #tpu.memory_space<vmem>>, %arg8: memref<1x128xf32, #tpu.memory_space<vmem>>, %arg9: memref<1x8x128xf32, #tpu.memory_space<vmem>>) attributes {dimension_semantics = [#tpu.dimension_semantics<parallel>], iteration_bounds = array<i64: 2>, scalar_prefetch = 0 : i64, scratch_operands = 0 : i64, tpu.core_type = #tpu.core_type<tc>, window_params = [{transform_indices = @transform_0, window_bounds = array<i64: 1, 8, 128>}, {transform_indices = @transform_1, window_bounds = array<i64: 1, 8, 128>}, {transform_indices = @transform_2, window_bounds = array<i64: 1, 8, 128>}, {transform_indices = @transform_3, window_bounds = array<i64: 1, 1, 8>}, {pipeline_mode = #tpu.pipeline_mode<synchronous>, transform_indices = @transform_4, window_bounds = array<i64: 12, 8, 128>}, {pipeline_mode = #tpu.pipeline_mode<synchronous>, transform_indices = @transform_5, window_bounds = array<i64: 12, 1, 8>}, {pipeline_mode = #tpu.pipeline_mode<synchronous>, transform_indices = @transform_6, window_bounds = array<i64: 4, 8, 128>}, {pipeline_mode = #tpu.pipeline_mode<synchronous>, transform_indices = @transform_7, window_bounds = array<i64: 1, 128>}, {transform_indices = @transform_8, window_bounds = array<i64: 1, 8, 128>}]} {
    %c0 = arith.constant 0 : index
    %c0_0 = arith.constant 0 : index
    %c0_1 = arith.constant 0 : index
    %0 = vector.load %arg1[%c0, %c0_0, %c0_1] : memref<1x8x128xf32, #tpu.memory_space<vmem>>, vector<1x8x128xf32>
    %1 = vector.shape_cast %0 : vector<1x8x128xf32> to vector<8x128xf32>
    %2 = vector.shape_cast %1 : vector<8x128xf32> to vector<1x8x128xf32>
    %3 = vector.shape_cast %2 : vector<1x8x128xf32> to vector<1x8x128xf32>
    %4 = vector.broadcast %3 : vector<1x8x128xf32> to vector<4x8x128xf32>
    %c0_2 = arith.constant 0 : index
    %c0_3 = arith.constant 0 : index
    %c0_4 = arith.constant 0 : index
    %5 = vector.load %arg2[%c0_2, %c0_3, %c0_4] : memref<1x8x128xf32, #tpu.memory_space<vmem>>, vector<1x8x128xf32>
    %6 = vector.shape_cast %5 : vector<1x8x128xf32> to vector<8x128xf32>
    %7 = vector.shape_cast %6 : vector<8x128xf32> to vector<1x8x128xf32>
    %8 = vector.shape_cast %7 : vector<1x8x128xf32> to vector<1x8x128xf32>
    %9 = vector.broadcast %8 : vector<1x8x128xf32> to vector<4x8x128xf32>
    %c0_5 = arith.constant 0 : index
    %c0_6 = arith.constant 0 : index
    %c0_7 = arith.constant 0 : index
    %10 = vector.load %arg3[%c0_5, %c0_6, %c0_7] : memref<1x8x128xf32, #tpu.memory_space<vmem>>, vector<1x8x128xf32>
    %11 = vector.shape_cast %10 : vector<1x8x128xf32> to vector<8x128xf32>
    %12 = vector.shape_cast %11 : vector<8x128xf32> to vector<1x8x128xf32>
    %13 = vector.shape_cast %12 : vector<1x8x128xf32> to vector<1x8x128xf32>
    %14 = vector.broadcast %13 : vector<1x8x128xf32> to vector<4x8x128xf32>
    %15 = tpu.concatenate %4, %9, %14 in 0 : vector<4x8x128xf32>, vector<4x8x128xf32>, vector<4x8x128xf32> -> vector<12x8x128xf32>
    %c0_8 = arith.constant 0 : index
    %c0_9 = arith.constant 0 : index
    %c0_10 = arith.constant 0 : index
    %16 = vector.load %arg5[%c0_8, %c0_9, %c0_10] : memref<12x8x128xf32, #tpu.memory_space<vmem>>, vector<12x8x128xf32>
    "tpu.trace_start"() <{level = 10 : i32, message = "htd,hkd->htk"}> : () -> ()
    %cst = arith.constant dense<0.000000e+00> : vector<12x8x8xf32>
    %17 = tpu.matmul %15, %16, %cst {dimension_numbers = #tpu.dot_dimension_numbers<[2], [2], [1], [1], [0, 0, 0, 1, 1, 1], [0], [0]>} : vector<12x8x128xf32>, vector<12x8x128xf32>, vector<12x8x8xf32> -> vector<12x8x8xf32>
    "tpu.trace_stop"() : () -> ()
    %c0_11 = arith.constant 0 : index
    %c0_12 = arith.constant 0 : index
    %c0_13 = arith.constant 0 : index
    %18 = vector.load %arg6[%c0_11, %c0_12, %c0_13] : memref<12x1x8xf32, #tpu.memory_space<vmem>>, vector<12x1x8xf32>
    %19 = vector.broadcast %18 : vector<12x1x8xf32> to vector<12x8x8xf32>
    %20 = arith.addf %17, %19 : vector<12x8x8xf32>
    %21 = vector.extract_strided_slice %20 {offsets = [0, 0, 0], sizes = [4, 8, 8], strides = [1, 1, 1]} : vector<12x8x8xf32> to vector<4x8x8xf32>
    %22 = vector.extract_strided_slice %20 {offsets = [4, 0, 0], sizes = [4, 8, 8], strides = [1, 1, 1]} : vector<12x8x8xf32> to vector<4x8x8xf32>
    %23 = vector.extract_strided_slice %20 {offsets = [8, 0, 0], sizes = [4, 8, 8], strides = [1, 1, 1]} : vector<12x8x8xf32> to vector<4x8x8xf32>
    "tpu.trace_start"() <{level = 10 : i32, message = "hqd,hkd->hqk"}> : () -> ()
    %cst_14 = arith.constant dense<0.000000e+00> : vector<4x8x8xf32>
    %24 = tpu.matmul %21, %22, %cst_14 {dimension_numbers = #tpu.dot_dimension_numbers<[2], [2], [1], [1], [0, 0, 0, 1, 1, 1], [0], [0]>} : vector<4x8x8xf32>, vector<4x8x8xf32>, vector<4x8x8xf32> -> vector<4x8x8xf32>
    "tpu.trace_stop"() : () -> ()
    %c0_15 = arith.constant 0 : index
    %c0_16 = arith.constant 0 : index
    %c0_17 = arith.constant 0 : index
    %25 = vector.load %arg4[%c0_15, %c0_16, %c0_17] : memref<1x1x8xf32, #tpu.memory_space<vmem>>, vector<1x1x8xf32>
    %26 = vector.shape_cast %25 : vector<1x1x8xf32> to vector<1x8xf32>
    %27 = vector.shape_cast %26 : vector<1x8xf32> to vector<1x1x8xf32>
    %28 = vector.broadcast %27 : vector<1x1x8xf32> to vector<4x8x8xf32>
    %29 = arith.addf %24, %28 : vector<4x8x8xf32>
    %cst_18 = arith.constant dense<0xFF800000> : vector<4x8xf32>
    %30 = vector.multi_reduction <maximumf>, %29, %cst_18 [2] : vector<4x8x8xf32> to vector<4x8xf32>
    %31 = vector.shape_cast %30 : vector<4x8xf32> to vector<4x8x1xf32>
    %32 = vector.broadcast %31 : vector<4x8x1xf32> to vector<4x8x8xf32>
    %33 = arith.subf %29, %32 : vector<4x8x8xf32>
    %34 = math.exp %33 : vector<4x8x8xf32>
    %cst_19 = arith.constant dense<0.000000e+00> : vector<4x8xf32>
    %35 = vector.multi_reduction <add>, %34, %cst_19 [2] : vector<4x8x8xf32> to vector<4x8xf32>
    %36 = vector.shape_cast %35 : vector<4x8xf32> to vector<4x8x1xf32>
    %37 = tpu.reciprocal %36 {approx = true} : vector<4x8x1xf32> -> vector<4x8x1xf32>
    %38 = vector.broadcast %37 : vector<4x8x1xf32> to vector<4x8x8xf32>
    %39 = arith.mulf %34, %38 : vector<4x8x8xf32>
    "tpu.trace_start"() <{level = 10 : i32, message = "hqk,hkd->hqd"}> : () -> ()
    %cst_20 = arith.constant dense<0.000000e+00> : vector<4x8x8xf32>
    %40 = tpu.matmul %39, %23, %cst_20 {dimension_numbers = #tpu.dot_dimension_numbers<[2], [1], [1], [2], [0, 0, 0, 1, 1, 2], [0], [0]>} : vector<4x8x8xf32>, vector<4x8x8xf32>, vector<4x8x8xf32> -> vector<4x8x8xf32>
    "tpu.trace_stop"() : () -> ()
    %c0_21 = arith.constant 0 : index
    %c0_22 = arith.constant 0 : index
    %c0_23 = arith.constant 0 : index
    %41 = vector.load %arg7[%c0_21, %c0_22, %c0_23] : memref<4x8x128xf32, #tpu.memory_space<vmem>>, vector<4x8x128xf32>
    "tpu.trace_start"() <{level = 10 : i32, message = "htk,hkd->htd"}> : () -> ()
    %cst_24 = arith.constant dense<0.000000e+00> : vector<4x8x128xf32>
    %42 = tpu.matmul %40, %41, %cst_24 {dimension_numbers = #tpu.dot_dimension_numbers<[2], [1], [1], [2], [0, 0, 0, 1, 1, 2], [0], [0]>} : vector<4x8x8xf32>, vector<4x8x128xf32>, vector<4x8x128xf32> -> vector<4x8x128xf32>
    "tpu.trace_stop"() : () -> ()
    %cst_25 = arith.constant dense<0.000000e+00> : vector<8x128xf32>
    %43 = vector.multi_reduction <add>, %42, %cst_25 [0] : vector<4x8x128xf32> to vector<8x128xf32>
    %c0_26 = arith.constant 0 : index
    %c0_27 = arith.constant 0 : index
    %44 = vector.load %arg8[%c0_26, %c0_27] : memref<1x128xf32, #tpu.memory_space<vmem>>, vector<1x128xf32>
    %45 = vector.broadcast %44 : vector<1x128xf32> to vector<8x128xf32>
    %46 = arith.addf %43, %45 : vector<8x128xf32>
    %c0_28 = arith.constant 0 : index
    %c0_29 = arith.constant 0 : index
    %c0_30 = arith.constant 0 : index
    %47 = vector.load %arg9[%c0_28, %c0_29, %c0_30] : memref<1x8x128xf32, #tpu.memory_space<vmem>>, vector<1x8x128xf32>
    %48 = vector.shape_cast %47 : vector<1x8x128xf32> to vector<8x128xf32>
    %49 = vector.shape_cast %46 : vector<8x128xf32> to vector<1x8x128xf32>
    tpu.vector_store %arg9[%c0_28, %c0_29, %c0_30], %49 {strides = array<i32>} : memref<1x8x128xf32, #tpu.memory_space<vmem>>, vector<1x8x128xf32>,
    return
  }
  func.func @transform_0(%arg0: i32) -> (i32, i32, i32) {
    %c0_i32 = arith.constant 0 : i32
    %c0_i32_0 = arith.constant 0 : i32
    %c0_i32_1 = arith.constant 0 : i32
    return %arg0, %c0_i32, %c0_i32_0 : i32, i32, i32
  }
  func.func @transform_1(%arg0: i32) -> (i32, i32, i32) {
    %c0_i32 = arith.constant 0 : i32
    %c0_i32_0 = arith.constant 0 : i32
    %c0_i32_1 = arith.constant 0 : i32
    return %arg0, %c0_i32, %c0_i32_0 : i32, i32, i32
  }
  func.func @transform_2(%arg0: i32) -> (i32, i32, i32) {
    %c0_i32 = arith.constant 0 : i32
    %c0_i32_0 = arith.constant 0 : i32
    %c0_i32_1 = arith.constant 0 : i32
    return %arg0, %c0_i32, %c0_i32_0 : i32, i32, i32
  }
  func.func @transform_3(%arg0: i32) -> (i32, i32, i32) {
    %c0_i32 = arith.constant 0 : i32
    %c0_i32_0 = arith.constant 0 : i32
    %c0_i32_1 = arith.constant 0 : i32
    return %arg0, %c0_i32, %c0_i32_0 : i32, i32, i32
  }
  func.func @transform_4(%arg0: i32) -> (i32, i32, i32) {
    %c0_i32 = arith.constant 0 : i32
    %c0_i32_0 = arith.constant 0 : i32
    %c0_i32_1 = arith.constant 0 : i32
    %c0_i32_2 = arith.constant 0 : i32
    return %c0_i32, %c0_i32_0, %c0_i32_1 : i32, i32, i32
  }
  func.func @transform_5(%arg0: i32) -> (i32, i32, i32) {
    %c0_i32 = arith.constant 0 : i32
    %c0_i32_0 = arith.constant 0 : i32
    %c0_i32_1 = arith.constant 0 : i32
    %c0_i32_2 = arith.constant 0 : i32
    return %c0_i32, %c0_i32_0, %c0_i32_1 : i32, i32, i32
  }
  func.func @transform_6(%arg0: i32) -> (i32, i32, i32) {
    %c0_i32 = arith.constant 0 : i32
    %c0_i32_0 = arith.constant 0 : i32
    %c0_i32_1 = arith.constant 0 : i32
    %c0_i32_2 = arith.constant 0 : i32
    return %c0_i32, %c0_i32_0, %c0_i32_1 : i32, i32, i32
  }
  func.func @transform_7(%arg0: i32) -> (i32, i32) {
    %c0_i32 = arith.constant 0 : i32
    %c0_i32_0 = arith.constant 0 : i32
    %c0_i32_1 = arith.constant 0 : i32
    return %c0_i32, %c0_i32_0 : i32, i32
  }
  func.func @transform_8(%arg0: i32) -> (i32, i32, i32) {
    %c0_i32 = arith.constant 0 : i32
    %c0_i32_0 = arith.constant 0 : i32
    %c0_i32_1 = arith.constant 0 : i32
    return %arg0, %c0_i32, %c0_i32_0 : i32, i32, i32
  }
}

</mosaic_0001>

<bundles_post_ra>
// kernel: tpu_custom_call.1
= control target key start
LH: loop header
LB: loop body
LE: loop exit
PB: predicated region body
PF: predicated region fallthrough
CT: control target
= control target key end

     0   :  { %s1882_s0 = inlined_call_operand.vmem [shape: f32[2,8,128], index: 0, kind: input, shape index: {}]   ;;  %s1883_s1 = inlined_call_operand.hbm [shape: f32[2,8,128], index: 1, kind: input, shape index: {}]   ;;  %s1884_s2 = inlined_call_operand.hbm [shape: f32[2,8,128], index: 2, kind: input, shape index: {}]   ;;  %s1885_s3 = inlined_call_operand.vmem [shape: f32[2,1,8], index: 3, kind: input, shape index: {}]   ;;  %s1886_s4 = inlined_call_operand.hbm [shape: f32[12,8,128], index: 4, kind: input, shape index: {}]   ;;  %s1887_s5 = inlined_call_operand.vmem [shape: f32[12,1,8], index: 5, kind: input, shape index: {}]   ;;  %s1888_s6 = inlined_call_operand.hbm [shape: f32[4,8,128], index: 6, kind: input, shape index: {}]   ;;  %s1889_s7 = inlined_call_operand.vmem [shape: f32[1,128], index: 7, kind: input, shape index: {}]   ;;  %s1890_s8 = inlined_call_operand.hbm [shape: f32[2,8,128], index: 8, kind: output, shape index: {}]  }
   0x1   :  { %1896 = sst [smem:[#allocation21_spill]] %s1886_s4 }
   0x2   :  { %1897 = sst [smem:[#allocation22_spill]] %s1888_s6 }
   0x3   :  { %13 = vsyncpa [#allocation3], 0 }
   0x4   :  { %15 = vsyncpa [#allocation3 + $0x1], 0 }
   0x5   :  { %16 = vsyncpa [#allocation6], 0 }
   0x6   :  { %18 = vsyncpa [#allocation6 + $0x1], 0 }
   0x7   :  { %19 = vsyncpa [#allocation9], 0 }
   0x8   :  { %20 = vsyncpa [#allocation4], 0 }
   0x9   :  { %22 = vsyncpa [#allocation4 + $0x1], 0  ;;  %s1617_s27 = smov 0   ;;  %s1619_s28 = smov 0  }
   0xa   :  { %s1621_s29 = smov 0   ;;  %s1623_s30 = smov 0  }
   0xb LB: > { %1898 = sst [smem:[#allocation16_spill]] %s1562_s29  ;;  %s1641_s12 = sadd.s32 4294967295, %s1566_s30   ;;  %s1566_s30 = sphi %s1623_s30, %s1914_s30   ;;  %s1562_s29 = sphi %s1621_s29, %s1916_s29   ;;  %s1558_s28 = sphi %s1619_s28, %s1918_s28   ;;  %s1554_s27 = sphi %s1617_s27, %s1917_s27  }
   0xc   : > { %1899 = sst [smem:[#allocation17_spill]] %s1566_s30  ;;  %p1229_p0 = scmp.ge.s32.totalorder %s1566_s30, 1 }
   0xd   : > { %s1900_s4 = sld [smem:[#allocation21_spill]]  ;;  %p75_p1 = scmp.eq.s32.totalorder %s1641_s12, 0 }
   0xe   : > { %p247_p2 = scmp.lt.s32.totalorder %s1566_s30, 3  ;;  %s1568_s14 = smov [#allocation7]  }
   0xf   : > { %s260_s15 = sshll.u32 %s1568_s14, 4  ;;  %s1902_s6 = sld [smem:[#allocation22_spill]]  ;;  %s261_s15 = int_to_ptr.vmem [resolvable:$true] %s260_s15 }
  0x10   : > { %p1646_p3 = pnand %p1229_p0, %p247_p2  ;;  %s1569_s19 = smov [#allocation8]  }
  0x11   : > { %s277_s20 = sshll.u32 %s1569_s19, 4  ;;  %s1570_s21 = smov 128   ;;  %s278_s20 = int_to_ptr.vmem [resolvable:$true] %s277_s20 }
  0x12   : > { %p1278_p4 = pneg %p1646_p3  ;;  %s1571_s22 = smov 8  }
  0x13   : > { %s258_s11 = sshll.u32 %s1900_s4, 4  ;;  %s1228_s23 = sadd.s32 4294967294, %s1566_s30   ;;  %s259_s11 = int_to_ptr.hbm [resolvable:$true] %s258_s11 }
  0x14   : > { %p1279_p6 = pnand %p1278_p4, %p75_p1  ;;  %s1660_s24 = sadd.s32 1, %s1566_s30  }
  0x15   : > { %s275_s18 = sshll.u32 %s1902_s6, 4  ;;  %1903 = sst [smem:[#allocation18_spill]] %s1660_s24  ;;  %s276_s18 = int_to_ptr.hbm [resolvable:$true] %s275_s18 }
  0x16   : > { %1281 = dma.hbm_to_vmem [thread:$0]  (!%p1279_p6), %s259_s11, 1536, %s261_s15, [#allocation6], %s1570_s21, %s1570_s21, %s1571_s22  }
  0x17   : > { %1284 = dma.hbm_to_vmem [thread:$0]  (!%p1279_p6), %s276_s18, 512, %s278_s20, [#allocation9], %s1570_s21, %s1570_s21, %s1571_s22  }
  0x18   : > { %s58_s25 = ssub.s32 %s1566_s30, %s1660_s24  ;;  %s61_s26 = sadd.s32 1, %s1562_s29 }
  0x19   : > { %p59_p7 = scmp.eq.s32.totalorder %s58_s25, 0  ;;  %p68_p8 = scmp.ne.s32.totalorder %s1562_s29, %s1558_s28 }
  0x1a   : > { %p69_p9 = scmp.eq.s32.totalorder %s1566_s30, 0  ;;  %p74_p10 = scmp.ne.s32.totalorder %s1558_s28, %s1554_s27 }
  0x1b   : > { %s1671_s9 = scalar_select %p59_p7, %s1562_s29, %s61_s26  }
  0x1c   : > { %p1673_p11 = por %p69_p9, %p68_p8  ;;  %p1679_p12 = por %p75_p1, %p74_p10 }
  0x1d   : > { %1904 = sst [smem:[#allocation19_spill]] %s1671_s9  ;;  %p234_p13 = scmp.eq.s32.totalorder %s1641_s12, 1 }
  0x1e   : > { %p240_p0 = scmp.eq.s32.totalorder %s1228_s23, 1  ;;  %p1298_p2 = scmp.lt.s32.totalorder %s1566_s30, 2 }
  0x1f   : > { %s301_s14 = sand.u32 1, %s1562_s29   ;;  %p1686_p4 = por %p234_p13, %p68_p8 }
  0x20   : > { %p1690_p6 = por %p240_p0, %p74_p10  ;;  %s1694_s17 = sshll.u32 %s301_s14, 3 }
  0x21   : > { %s1234_s18 = sshll.u32 %s1566_s30, 3  ;;  %s305_s22 = scalar_lea.vmem [#allocation2], %s1694_s17 }
  0x22   : > { %s1908_s16 = scalar_select %p1690_p6, 1, 0 }
  0x23   : > { %s309_s21 = scalar_lea.hbm %s1883_s1, %s1234_s18  ;;  %s313_s23 = sshll.u32 %s305_s22, 4  ;;  %s314_s23 = int_to_ptr.vmem [resolvable:$true] %s313_s23 }
  0x24   : > { %1909 = sst [smem:[#allocation20_spill]] %s1908_s16  ;;  %s311_s25 = sshll.u32 %s309_s21, 4  ;;  %s312_s25 = int_to_ptr.hbm [resolvable:$true] %s311_s25 }
  0x25   : > { %p1703_p7 = pnand %p1298_p2, %p1673_p11  ;;  %s328_s9 = scalar_lea.hbm %s1884_s2, %s1234_s18 }
  0x26   : > { %s320_s29 = sand.u32 1, %s1566_s30   ;;  %s302_s24 = scalar_lea.sflag [#allocation3], %s301_s14 }
  0x27   : > { %s1428_s19 = sshra.s32 %s312_s25, 4  ;;  %p1432_p9 = pneg %p1703_p7  ;;  %s1429_s19 = int_to_ptr.hbm [resolvable:$true] %s1428_s19 }
  0x28   : > { %s1430_s20 = scalar_lea.hbm %s1429_s19, 8  ;;  %s1435_s22 = scalar_lea.hbm %s1883_s1, 16 }
  0x29   : > { %p1431_p8 = scmp.ne.s32.totalorder %s1429_s19, %s1430_s20  ;;  %p1436_p13 = scmp.lt.s32.totalorder %s1429_s19, %s1883_s1 }
  0x2a   : > { %p1437_p0 = scmp.lt.s32.totalorder %s1435_s22, %s1430_s20 }
  0x2b   : > { %p1433_p10 = pnand %p1432_p9, %p1431_p8 }
  0x2c   : > { %p1438_p2 = por %p1437_p0, %p1436_p13 }
  0x2d   : > { %p1434_p11 = pneg %p1433_p10 }
  0x2f   : > { %p1439_p5 = pnand %p1438_p2, %p1434_p11 }
  0x31   : > { %1442 = shalt.err (!%p1439_p5)
}
  0x32   : > { %1288 = dma.hbm_to_vmem [thread:$0]  (!%p1703_p7), %s312_s25, 128, %s314_s23, %s302_s24  }
  0x33   : > { %s330_s14 = sshll.u32 %s328_s9, 4  ;;  %s324_s18 = scalar_lea.vmem [#allocation5], %s1694_s17  ;;  %s331_s14 = int_to_ptr.hbm [resolvable:$true] %s330_s14 }
  0x34   : > { %s332_s30 = sshll.u32 %s324_s18, 4  ;;  %s321_s10 = scalar_lea.sflag [#allocation6], %s320_s29  ;;  %s333_s30 = int_to_ptr.vmem [resolvable:$true] %s332_s30 }
  0x35   : > { %s1458_s21 = sshra.s32 %s331_s14, 4  ;;  %s1465_s22 = scalar_lea.hbm %s1884_s2, 16  ;;  %s1459_s21 = int_to_ptr.hbm [resolvable:$true] %s1458_s21 }
  0x36   : > { %s1460_s16 = scalar_lea.hbm %s1459_s21, 8  ;;  %p1466_p5 = scmp.lt.s32.totalorder %s1459_s21, %s1884_s2 }
  0x37   : > { %p1461_p8 = scmp.ne.s32.totalorder %s1459_s21, %s1460_s16  ;;  %p1467_p13 = scmp.lt.s32.totalorder %s1465_s22, %s1460_s16 }
  0x39   : > { %p1463_p10 = pnand %p1461_p8, %p1432_p9  ;;  %p1468_p0 = por %p1467_p13, %p1466_p5 }
  0x3b   : > { %p1464_p11 = pneg %p1463_p10 }
  0x3d   : > { %p1469_p2 = pnand %p1468_p0, %p1464_p11 }
  0x3f   : > { %1472 = shalt.err (!%p1469_p2)
}
  0x40   : > { %1291 = dma.hbm_to_vmem [thread:$0]  (!%p1703_p7), %s331_s14, 128, %s333_s30, %s321_s10  }
  0x41   : > { %347 = sbr.rel (%p1646_p3) target bundleno = 897 (0x381), region = 52  ;;  %s1739_s29 = sand.u32 (!%p1646_p3), 1, %s1558_s28  }
  0x42   : > { %s1742_s9 = sshll.u32 (!%p1646_p3), %s1739_s29, 3  ;;  %s350_s17 = scalar_lea.sflag (!%p1646_p3), [#allocation3], %s1739_s29 }
  0x43   : > { %s353_s16 = scalar_lea.vmem (!%p1646_p3), [#allocation2], %s1742_s9 }
  0x46   : > { %1533 = dma.done.wait (%p1679_p12), %s350_s17, 128  }
  0x47   : > { %1535 = vsyncadd (%p1679_p12), %s350_s17, 4294967168  ;;  %s359_s30 = sand.u32 1, %s1641_s12   ;;  %s363_s23 = scalar_lea.vmem [#allocation5], %s1742_s9 }
  0x48   : > { %s360_s13 = scalar_lea.sflag [#allocation6], %s359_s30 }
  0x49   : > { %1537 = dma.done.wait (%p1679_p12), %s360_s13, 128  }
  0x4a   : > { %1539 = vsyncadd (%p1679_p12), %s360_s13, 4294967168 }
  0x4b   : > { %1541 = dma.done.wait (%p75_p1), [#allocation6], 1536  }
  0x4c   : > { %1543 = vsyncadd (%p75_p1), [#allocation6], 4294965760 }
  0x4d   : > { %1545 = dma.done.wait (%p75_p1), [#allocation9], 512  }
  0x4e   : > { %1547 = vsyncadd (%p75_p1), [#allocation9], 4294966784  ;;  %p419_p3 = scmp.lt.s32.totalorder %s1641_s12, 1  ;;  %v429_v0 = vld [vmem:[#allocation7] sm:$0xff]  ;;  %v431_v1 = vld [vmem:[#allocation7 + $0x10] sm:$0xff]  ;;  %vm733_vm0 = vcmask 64512  }
  0x4f   : > { %v432_v2 = vld [vmem:[#allocation7 + $0x18] sm:$0xff]  ;;  %504 = vmatpush.xpose.msra.mxu0 %v429_v0  ;;  %544 = vmatpush.xpose.msra.mxu2 %v431_v1  ;;  %v430_v4 = vld [vmem:[#allocation7 + $0x8] sm:$0xff]  ;;  %v433_v5 = vld [vmem:[#allocation7 + $0x20] sm:$0xff]  ;;  %s418_s18 = scalar_lea.vmem [#allocation10], %s1742_s9  ;;  %s1508_s17 = scalar_lea.hbm %s1890_s8, 16 }
  0x50   : > { %s1766_s25 = scalar_select %p419_p3, %s1641_s12, 1  ;;  %564 = vmatpush.xpose.msra.mxu3 %v432_v2  ;;  %524 = vmatpush.xpose.msra.mxu1 %v430_v4  ;;  %v435_v6 = vld [vmem:[#allocation7 + $0x30] sm:$0xff]  ;;  %v436_v7 = vld [vmem:[#allocation7 + $0x38] sm:$0xff]  ;;  %v434_v8 = vld [vmem:[#allocation7 + $0x28] sm:$0xff] }
  0x51   : > { %v427_v9 = vld [vmem:[%s353_s16] sm:$0xff]  ;;  %v428_v11 = vld [vmem:[%s363_s23] sm:$0xff]  ;;  %s1092_s10 = sshll.u32 %s418_s18, 4  ;;  %s1093_s10 = int_to_ptr.vmem [resolvable:$true] %s1092_s10 }
  0x52   : > { %s1243_s11 = sshll.u32 %s1766_s25, 3  ;;  %s425_s21 = scalar_lea.vmem %s1885_s3, %s1766_s25  ;;  %v437_v10 = vld [vmem:[#allocation7 + $0x40] sm:$0xff]  ;;  %v439_v12 = vld [vmem:[#allocation7 + $0x50] sm:$0xff]  ;;  %v440_v13 = vld [vmem:[#allocation7 + $0x58] sm:$0xff] }
  0x53   : > { %s422_s14 = scalar_lea.vmem %s1882_s0, %s1243_s11  ;;  %584 = vmatpush.xpose.msrb.mxu0 %v433_v5  ;;  %624 = vmatpush.xpose.msrb.mxu2 %v435_v6  ;;  %v438_v14 = vld [vmem:[#allocation7 + $0x48] sm:$0xff]  ;;  %v1342_v17 = vld [vmem:[%s1887_s5 + $0x4] ss:$0 sm:$0xff]  ;;  %v1338_v18 = vld [vmem:[%s1887_s5] ss:$0 sm:$0xff]  ;;  %s1261_s25 = sshll.u32 %s1641_s12, 3 }
  0x54   : > { %v426_v3 = vld [vmem:[%s422_s14] sm:$0xff]  ;;  %644 = vmatpush.xpose.msrb.mxu3 %v436_v7  ;;  %604 = vmatpush.xpose.msrb.mxu1 %v434_v8  ;;  %v1346_v39 = vld [vmem:[%s1887_s5 + $0x8] ss:$0 sm:$0xff]  ;;  %v1347_v42 = vld [vmem:[%s1887_s5 + $0x9] ss:$0 sm:$0xff]  ;;  %s1090_s26 = scalar_lea.hbm %s1890_s8, %s1261_s25  ;;  %s1080_s12 = scalar_lea.sflag [#allocation4], %s1739_s29 }
  0x55   : > { %505 = vmatmul.f32.vlgmr.msra.gmra.mxu0 %v426_v3  ;;  %545 = vmatmul.f32.vlgmr.msra.gmra.mxu2 %v426_v3  ;;  %v1345_v20 = vld [vmem:[%s1887_s5 + $0x5] ss:$0 sm:$0xff]  ;;  %v1341_v22 = vld [vmem:[%s1887_s5 + $0x1] ss:$0 sm:$0xff]  ;;  %v1343_v29 = vld [vmem:[%s1887_s5 + $0x6] ss:$0 sm:$0xff] }
  0x56   : > { %565 = vmatmul.f32.vlgmr.msra.gmra.mxu3 %v426_v3  ;;  %525 = vmatmul.f32.vlgmr.msra.gmra.mxu1 %v426_v3  ;;  %v1344_v30 = vld [vmem:[%s1887_s5 + $0x7] ss:$0 sm:$0xff]  ;;  %v1339_v31 = vld [vmem:[%s1887_s5 + $0x2] ss:$0 sm:$0xff]  ;;  %v1340_v33 = vld [vmem:[%s1887_s5 + $0x3] ss:$0 sm:$0xff] }
  0x57   : > { %664 = vmatpush.xpose.msra.mxu0 %v437_v10  ;;  %704 = vmatpush.xpose.msra.mxu2 %v439_v12  ;;  %v1349_v45 = vld [vmem:[%s1887_s5 + $0xa] ss:$0 sm:$0xff]  ;;  %v1350_v46 = vld [vmem:[%s1887_s5 + $0xb] ss:$0 sm:$0xff]  ;;  %v1348_v51 = vld [vmem:[%s425_s21] ss:$0 sm:$0xff] }
  0x58   : > { %724 = vmatpush.xpose.msra.mxu3 %v440_v13  ;;  %684 = vmatpush.xpose.msra.mxu1 %v438_v14  ;;  %s1094_s19 = sshll.u32 %s1090_s26, 4  ;;  %s1095_s19 = int_to_ptr.hbm [resolvable:$true] %s1094_s19 }
  0x59   : > { %s1502_s20 = sshra.s32 %s1095_s19, 4  ;;  %s1503_s20 = int_to_ptr.hbm [resolvable:$true] %s1502_s20 }
  0x5a   : > { %s1504_s22 = scalar_lea.hbm %s1503_s20, 8  ;;  %p1509_p9 = scmp.lt.s32.totalorder %s1503_s20, %s1890_s8 }
  0x5b   : > { %p1505_p1 = scmp.ne.s32.totalorder %s1503_s20, %s1504_s22  ;;  %p1510_p8 = scmp.lt.s32.totalorder %s1508_s17, %s1504_s22 }
  0x5d   : > { %585 = vmatmul.f32.vlgmr.msrb.gmra.mxu0 %v427_v9  ;;  %625 = vmatmul.f32.vlgmr.msrb.gmra.mxu2 %v427_v9  ;;  %p1506_p12 = pnand %p1505_p1, %p1686_p4  ;;  %p1511_p10 = por %p1510_p8, %p1509_p9 }
  0x5e   : > { %645 = vmatmul.f32.vlgmr.msrb.gmra.mxu3 %v427_v9  ;;  %605 = vmatmul.f32.vlgmr.msrb.gmra.mxu1 %v427_v9 }
  0x5f   : > { %p1507_p7 = pneg %p1506_p12 }
  0x61   : > { %p1512_p11 = pnand %p1511_p10, %p1507_p7 }
  0x65   : > { %665 = vmatmul.f32.vlgmr.msra.gmra.mxu0 %v428_v11  ;;  %705 = vmatmul.f32.vlgmr.msra.gmra.mxu2 %v428_v11 }
  0x66   : > { %725 = vmatmul.f32.vlgmr.msra.gmra.mxu3 %v428_v11  ;;  %685 = vmatmul.f32.vlgmr.msra.gmra.mxu1 %v428_v11 }
  0xd2   : > { %v506_v15 = vpop.f32.mrf.mxu0 }
  0xd3   : > { %v526_v16 = vpop.f32.mrf.mxu1  ;;  %v507_v26 = vadd.f32 %v1338_v18, %v506_v15 }
  0xd4   : > { %v527_v28 = vadd.f32 %v1341_v22, %v526_v16 }
  0xd8   : > { %v546_v19 = vpop.f32.mrf.mxu2 }
  0xd9   : > { %v566_v21 = vpop.f32.mrf.mxu3  ;;  %v547_v37 = vadd.f32 %v1339_v31, %v546_v19 }
  0xda   : > { %v586_v23 = vpop.f32.mrf.mxu0  ;;  %v567_v38 = vadd.f32 %v1340_v33, %v566_v21  ;;  %v975_v33 = vld [vmem:[#allocation8 + $0x8] sm:$0xff] }
  0xdb   : > { %v587_v24 = vadd.f32 %v1342_v17, %v586_v23  ;;  %v606_v25 = vpop.f32.mrf.mxu1 }
  0xdc   : > { %v607_v27 = vadd.f32 %v1345_v20, %v606_v25 }
  0xdd   : > { %1244 = vmatpush.xpose.msk.msrb.mxu0 %vm733_vm0, %v587_v24 }
  0xde   : > { %1246 = vmatpush.xpose.msk.msrb.mxu1 %vm733_vm0, %v607_v27 }
  0xe0   : > { %v626_v32 = vpop.f32.mrf.mxu2  ;;  %1245 = vmatmul.msk.f32.vlgmr.msrb.gmra.mxu0 %vm733_vm0, %v507_v26 }
  0xe1   : > { %v627_v34 = vadd.f32 %v1343_v29, %v626_v32  ;;  %v646_v35 = vpop.f32.mrf.mxu3  ;;  %1247 = vmatmul.msk.f32.vlgmr.msrb.gmra.mxu1 %vm733_vm0, %v527_v28  ;;  %v974_v32 = vld [vmem:[#allocation8] sm:$0xff] }
  0xe2   : > { %v647_v36 = vadd.f32 %v1344_v30, %v646_v35  ;;  %v666_v40 = vpop.f32.mrf.mxu0  ;;  %v977_v35 = vld [vmem:[#allocation8 + $0x18] sm:$0xff] }
  0xe3   : > { %1248 = vmatpush.xpose.msk.msrb.mxu2 %vm733_vm0, %v627_v34  ;;  %v667_v41 = vadd.f32 %v1346_v39, %v666_v40  ;;  %v686_v43 = vpop.f32.mrf.mxu1  ;;  %v976_v34 = vld [vmem:[#allocation8 + $0x10] sm:$0xff] }
  0xe4   : > { %1250 = vmatpush.xpose.msk.msrb.mxu3 %vm733_vm0, %v647_v36  ;;  %v687_v44 = vadd.f32 %v1347_v42, %v686_v43 }
  0xe5   : > { %900 = vmatpush.msra.mxu0 %v667_v41 }
  0xe6   : > { %1249 = vmatmul.msk.f32.vlgmr.msrb.gmra.mxu2 %vm733_vm0, %v547_v37  ;;  %923 = vmatpush.msra.mxu1 %v687_v44 }
  0xe7   : > { %1251 = vmatmul.msk.f32.vlgmr.msrb.gmra.mxu3 %vm733_vm0, %v567_v38  ;;  %996 = vmatpush.msrb.mxu0 %v974_v32 }
  0xe8   : > { %v706_v47 = vpop.f32.mrf.mxu2  ;;  %1019 = vmatpush.msrb.mxu1 %v975_v33 }
  0xe9   : > { %v726_v48 = vpop.f32.mrf.mxu3  ;;  %v707_v49 = vadd.f32 %v1349_v45, %v706_v47  ;;  %v1351_v45 = vld [vmem:[%s1889_s7] ss:$0 sm:$0xff] }
  0xea   : > { %v727_v50 = vadd.f32 %v1350_v46, %v726_v48 }
  0xeb   : > { %946 = vmatpush.msra.mxu2 %v707_v49 }
  0xec   : > { %969 = vmatpush.msra.mxu3 %v727_v50 }
  0xed   : > { %1042 = vmatpush.msrb.mxu2 %v976_v34 }
  0xee   : > { %1065 = vmatpush.msrb.mxu3 %v977_v35 }
 0x15d   : > { %v757_v52 = vpop.f32.mrf.mxu0 }
 0x15e   : > { %v758_v53 = vadd.f32 %v1348_v51, %v757_v52  ;;  %v783_v54 = vpop.f32.mrf.mxu1 }
 0x15f   : > { %v784_v56 = vadd.f32 %v1348_v51, %v783_v54 }
 0x160   : > { %v838_v55 = vsel %vm733_vm0, %v758_v53, -inf }
 0x161   : > { %839 = vmax.xlane.f32.xlu1 %v838_v55  ;;  %v841_v57 = vsel %vm733_vm0, %v784_v56, -inf }
 0x169   : > { %v809_v58 = vpop.f32.mrf.mxu2  ;;  %842 = vmax.xlane.f32.xlu1 %v841_v57 }
 0x16a   : > { %v810_v59 = vadd.f32 %v1348_v51, %v809_v58  ;;  %v835_v61 = vpop.f32.mrf.mxu3 }
 0x16b   : > { %v836_v62 = vadd.f32 %v1348_v51, %v835_v61 }
 0x16c   : > { %v844_v60 = vsel %vm733_vm0, %v810_v59, -inf }
 0x16d   : > { %845 = vmax.xlane.f32.xlu0 %v844_v60  ;;  %v847_v63 = vsel %vm733_vm0, %v836_v62, -inf }
 0x175   : > { %848 = vmax.xlane.f32.xlu0 %v847_v63 }
 0x1d4   : > { %v840_v0 = vpop.xlane.xlu1 %839 }
 0x1d5   : > { %v850_v1 = vsub.f32 %v758_v53, %v840_v0 }
 0x1d7   : > { %v854_v2 = vmul.f32 1.442695, %v850_v1 }
 0x1d9   : > { %1352 = vpow2.f32 %v854_v2 }
 0x1dc   : > { %v843_v3 = vpop.xlane.xlu1 %842 }
 0x1dd   : > { %v851_v4 = vsub.f32 %v784_v56, %v843_v3 }
 0x1df   : > { %v1353_v5 = vpop.eup %1352  ;;  %v856_v6 = vmul.f32 1.442695, %v851_v4 }
 0x1e0   : > { %v846_v7 = vpop.xlane.xlu0 %845  ;;  %v862_v8 = vsel %vm733_vm0, %v1353_v5, 0.0 }
 0x1e1   : > { %1354 = vpow2.f32 %v856_v6  ;;  %v852_v9 = vsub.f32 %v810_v59, %v846_v7  ;;  %863 = vadd.xlane.f32.xlu0 %v862_v8 }
 0x1e3   : > { %v858_v10 = vmul.f32 1.442695, %v852_v9 }
 0x1e5   : > { %1356 = vpow2.f32 %v858_v10 }
 0x1e7   : > { %v1355_v11 = vpop.eup %1354 }
 0x1e8   : > { %v849_v12 = vpop.xlane.xlu0 %848  ;;  %v865_v13 = vsel %vm733_vm0, %v1355_v11, 0.0 }
 0x1e9   : > { %v853_v14 = vsub.f32 %v836_v62, %v849_v12  ;;  %866 = vadd.xlane.f32.xlu1 %v865_v13 }
 0x1eb   : > { %v1357_v15 = vpop.eup %1356  ;;  %v860_v16 = vmul.f32 1.442695, %v853_v14 }
 0x1ec   : > { %v868_v17 = vsel %vm733_vm0, %v1357_v15, 0.0 }
 0x1ed   : > { %1358 = vpow2.f32 %v860_v16  ;;  %869 = vadd.xlane.f32.xlu2 %v868_v17 }
 0x1f3   : > { %v1359_v18 = vpop.eup %1358 }
 0x1f4   : > { %v871_v19 = vsel %vm733_vm0, %v1359_v18, 0.0 }
 0x1f5   : > { %872 = vadd.xlane.f32.xlu2 %v871_v19 }
 0x254   : > { %v864_v20 = vpop.xlane.xlu0 %863 }
 0x255   : > { %1360 = vrcp.f32 %v864_v20 }
 0x25b   : > { %v1361_v21 = vpop.eup %1360 }
 0x25c   : > { %v878_v22 = vmul.f32 %v1361_v21, %v1353_v5  ;;  %v867_v23 = vpop.xlane.xlu1 %866 }
 0x25d   : > { %1362 = vrcp.f32 %v867_v23 }
 0x25e   : > { %1252 = vmatmul.msk.f32.vlgmr.msra.gmra.mxu0 %vm733_vm0, %v878_v22 }
 0x260   : > { %v870_v24 = vpop.xlane.xlu2 %869 }
 0x261   : > { %1364 = vrcp.f32 %v870_v24 }
 0x263   : > { %v1363_v25 = vpop.eup %1362 }
 0x264   : > { %v879_v26 = vmul.f32 %v1363_v25, %v1355_v11 }
 0x266   : > { %1253 = vmatmul.msk.f32.vlgmr.msra.gmra.mxu1 %vm733_vm0, %v879_v26 }
 0x267   : > { %v1365_v27 = vpop.eup %1364 }
 0x268   : > { %v880_v28 = vmul.f32 %v1365_v27, %v1357_v15  ;;  %v873_v29 = vpop.xlane.xlu2 %872 }
 0x269   : > { %1366 = vrcp.f32 %v873_v29 }
 0x26a   : > { %1254 = vmatmul.msk.f32.vlgmr.msra.gmra.mxu2 %vm733_vm0, %v880_v28 }
 0x26f   : > { %v1367_v30 = vpop.eup %1366 }
 0x270   : > { %v881_v31 = vmul.f32 %v1367_v30, %v1359_v18 }
 0x272   : > { %1255 = vmatmul.msk.f32.vlgmr.msra.gmra.mxu3 %vm733_vm0, %v881_v31 }
 0x2db   : > { %v902_v36 = vpop.f32.mrf.mxu0 }
 0x2dc   : > { %1256 = vmatmul.msk.f32.vlgmr.msrb.gmra.mxu0 %vm733_vm0, %v902_v36 }
 0x2e3   : > { %v925_v37 = vpop.f32.mrf.mxu1 }
 0x2e4   : > { %1257 = vmatmul.msk.f32.vlgmr.msrb.gmra.mxu1 %vm733_vm0, %v925_v37 }
 0x2ed   : > { %v948_v38 = vpop.f32.mrf.mxu2 }
 0x2ee   : > { %1258 = vmatmul.msk.f32.vlgmr.msrb.gmra.mxu2 %vm733_vm0, %v948_v38 }
 0x2f5   : > { %v971_v39 = vpop.f32.mrf.mxu3 }
 0x2f6   : > { %1259 = vmatmul.msk.f32.vlgmr.msrb.gmra.mxu3 %vm733_vm0, %v971_v39 }
 0x359   : > { %v998_v41 = vpop.f32.mrf.mxu0 }
 0x361   : > { %v1021_v40 = vpop.f32.mrf.mxu1 }
 0x362   : > { %v1070_v43 = vadd.f32 %v1021_v40, %v998_v41 }
 0x371   : > { %v1044_v42 = vpop.f32.mrf.mxu2 }
 0x372   : > { %v1071_v44 = vadd.f32 %v1070_v43, %v1044_v42 }
 0x379   : > { %v1067_v46 = vpop.f32.mrf.mxu3 }
 0x37a   : > { %v1072_v47 = vadd.f32 %v1071_v44, %v1067_v46 }
 0x37c   : > { %v1077_v48 = vadd.f32 %v1351_v45, %v1072_v47 }
 0x37e   : > { %1078 = vst [vmem:[%s418_s18] sm:$0xff] %v1077_v48 }
 0x37f   : > { %1515 = shalt.err (!%p1512_p11)
}
 0x380   : > { %1276 = dma.vmem_to_hbm [thread:$0]  (%p1686_p4), %s1093_s10, 128, %s1095_s19, %s1080_s12  }
 0x381 PF: > { %s1912_s30 = sld [smem:[#allocation17_spill]]  ;;  %s1106_s13 = sand.u32 1, %s1554_s27  }
 0x382   : > { %s1107_s23 = scalar_lea.sflag [#allocation4], %s1106_s13 }
 0x387   : > { %p1913_p5 = scmp.ge.s32.totalorder %s1912_s30, 2 }
 0x389   : > { %p1293_p13 = pnand %p1913_p5, %p1690_p6 }
 0x38b   : > { %p1294_p0 = pneg %p1293_p13 }
 0x38d   : > { %1549 = dma.done.wait (%p1294_p0), %s1107_s23, 128  }
 0x38e   : > { %1551 = vsyncadd (%p1294_p0), %s1107_s23, 4294967168  ;;  %s1914_s30 = sld [smem:[#allocation18_spill]]  ;;  %s1917_s27 = smov %s1558_s28 }
 0x38f   : > { %s1915_s25 = sld [smem:[#allocation16_spill]] }
 0x390   : > { %s1916_s29 = sld [smem:[#allocation19_spill]] }
 0x394   : > { %p25_p2 = scmp.ge.s32.totalorder %s1914_s30, 4  }
 0x395   : > { %s1918_s28 = smov %s1915_s25 }
 0x396   :  { %27 = sbr.rel (!%p25_p2) target bundleno = 11 (0xb), region = 124 }
 0x39b   :  { %1113 = vsyncpa [#allocation3], 1 }
 0x39c   :  { %1115 = vsyncpa [#allocation3 + $0x1], 1 }
 0x39d   :  { %1116 = vsyncpa [#allocation6], 1 }
 0x39e   :  { %1118 = vsyncpa [#allocation6 + $0x1], 1 }
 0x39f   :  { %1119 = vsyncpa [#allocation9], 1 }
 0x3a0   :  { %1120 = vsyncpa [#allocation4], 1 }
 0x3a1   :  { %1122 = vsyncpa [#allocation4 + $0x1], 1 }

</bundles_post_ra>
